<compile_context>
chip_gen: v5e
topology: v5e:2x2
jax: 0.10.0
libtpu: 0.0.40
codegen_flags: <defaults>
</compile_context>

<pallas_src>
import numpy as np
import jax
import jax.numpy as jnp
from jax import lax
from jax.experimental import pallas as pl
from jax.experimental.pallas import tpu as pltpu

EPS = 1e-5


def _round_up(x, m):
    return (x + m - 1) // m * m


def _vmem_limit_bytes():
    # VMEM-budget-driven tiling: 64 MiB physical on v7x, 128 MiB on v5e/v6e.
    cap = 64 * 1024 * 1024
    try:
        cap = int(pltpu.get_tpu_info().vmem_capacity_bytes)
    except Exception:
        pass
    return max(32 * 1024 * 1024, min(cap * 3 // 4, 112 * 1024 * 1024))


def _pick_tile(lw_p, min_tile, fixed_bytes, per_lane_bytes, budget):
    """Largest multiple-of-128 divisor of lw_p that is >= min_tile and fits."""
    nt = lw_p // 128
    cands = [d * 128 for d in range(1, nt + 1) if nt % d == 0 and d * 128 >= min_tile]
    if not cands:
        cands = [lw_p]
    for lt in sorted(cands, reverse=True):
        if fixed_bytes + per_lane_bytes * lt <= budget:
            return lt
    return min(cands)


# ---------------- pass 1: in-kernel im2col + conv (MXU) + partial BN stats ---
def _make_conv_stats_kernel(K, Wp):
    taps = [(ki, kj) for ki in range(K) for kj in range(K)]

    def kernel(xc_ref, xn_ref, w_ref, mask_ref, y_ref, stats_ref, acc_stats):
        # xc_ref/xn_ref: (C_in_p, Lt) current / next flattened-input q-tile
        # w_ref:         (K*K, C_out_p, C_in_p) per-tap weights (resident)
        # mask_ref:      (1, Lt) f32 validity mask for the wide coordinates
        # y_ref:         (C_out_p, Lt) conv output tile (compute dtype)
        # stats_ref:     (C_out_p, 2)  per-sample [sum, sum_sq]
        # acc_stats:     (C_out_p, 2)  f32 VMEM scratch accumulator
        t = pl.program_id(1)
        lt = y_ref.shape[-1]

        # Current tile plus halo from the next tile: every tap offset
        # off = ki*Wp + kj (<= Lt by construction) is a static lane slice.
        xcat = jnp.concatenate([xc_ref[...], xn_ref[...]], axis=1)  # (C_in_p, 2*Lt)

        acc = None
        for idx, (ki, kj) in enumerate(taps):
            off = ki * Wp + kj
            xs = xcat[:, off:off + lt]                              # (C_in_p, Lt)
            c = jnp.dot(w_ref[idx], xs, preferred_element_type=jnp.float32)
            acc = c if acc is None else acc + c
        y_ref[...] = acc.astype(y_ref.dtype)                        # lane-dense store

        # Partial BN statistics from the f32 accumulator, masked to valid
        # output pixels (wide-coordinate junk columns / padding excluded).
        # NOTE: E[y^2]-mean^2 in f32 can cancel for large DC offsets; it is
        # clamped at 0 in the fold below (acceptable for typical activations).
        am = acc * mask_ref[...]
        part = jnp.concatenate(
            [jnp.sum(am, axis=1, keepdims=True),
             jnp.sum(am * am, axis=1, keepdims=True)], axis=1)      # (C_out_p, 2)

        @pl.when(t == 0)
        def _init():
            acc_stats[...] = jnp.zeros_like(acc_stats)

        acc_stats[...] += part

        @pl.when(t == pl.num_programs(1) - 1)
        def _flush():
            stats_ref[...] = acc_stats[...]

    return kernel


# ---------------- pass 2: apply BN (scale/shift) + ReLU ----------------------
def _bn_relu_kernel(y_ref, a_ref, b_ref, o_ref):
    y = y_ref[...].astype(jnp.float32)
    o_ref[...] = jnp.maximum(y * a_ref[...] + b_ref[...], 0.0)


def conv_block_2d(x, weight, gamma, beta, *, stride=1, padding=1,
                  tile_q=None, tile_q2=None, compute_dtype=jnp.bfloat16):
    """ConvBlock2d forward: Conv2d(no bias) -> BatchNorm2d(batch stats) -> ReLU.

    x: (N, C_in, H, W) NCHW, weight: (C_out, C_in, K, K) (PyTorch layout).
    """
    if stride != 1:
        # TODO(synk): stride > 1 needs strided tap reads; not implemented.
        raise NotImplementedError("Pallas ConvBlock2d path supports stride == 1")

    N, C_in, H, W = x.shape
    C_out, _, K, _ = weight.shape
    p = padding
    Hp, Wp = H + 2 * p, W + 2 * p
    Ho, Wo = Hp - K + 1, Wp - K + 1
    assert Ho > 0 and Wo > 0

    cd = jnp.dtype(compute_dtype)
    ce = cd.itemsize

    C_in_p = _round_up(C_in, 8)
    C_out_p = _round_up(C_out, 8)

    # "Wide" output coordinate: q = r*Wp + c, c in [0, Wp).  Columns c >= Wo
    # (and q >= Lw) are junk, masked out of the stats and sliced off at the end.
    Lw = Ho * Wp
    Lw_p = _round_up(Lw, 128)
    span = (K - 1) * Wp + (K - 1)            # max tap offset into the next tile

    vmem_limit = _vmem_limit_bytes()
    budget = vmem_limit - 2 * 1024 * 1024

    if tile_q is None:
        fixed = 2 * K * K * C_out_p * C_in_p * ce + 4 * C_out_p * 4
        per_q = (4 * C_in_p * ce             # two x tiles, double-buffered
                 + 2 * C_out_p * ce          # y tile, double-buffered
                 + 2 * 4                     # mask tile
                 + C_out_p * 4               # f32 accumulator
                 + 3 * C_in_p * ce)          # xcat + tap slices
        tile_q = _pick_tile(Lw_p, max(span, 128), int(fixed * 1.25),
                            int(per_q * 1.25), budget)
    assert Lw_p % tile_q == 0 and (tile_q % 128 == 0 or tile_q == Lw_p)
    assert tile_q >= span, (tile_q, span)
    T1 = Lw_p // tile_q

    # ---------------- XLA-side prep (cheap; no K^2 expansion) ----------------
    Lp_in = Lw_p + tile_q                    # one extra tile of zeros (halo)
    xp = jnp.pad(x.astype(cd),
                 ((0, 0), (0, C_in_p - C_in), (p, p), (p, p)))
    xf = xp.reshape(N, C_in_p, Hp * Wp)
    xf = jnp.pad(xf, ((0, 0), (0, 0), (0, Lp_in - Hp * Wp)))

    w_taps = jnp.pad(weight.astype(jnp.float32),
                     ((0, C_out_p - C_out), (0, C_in_p - C_in), (0, 0), (0, 0)))
    # (C_out_p, C_in_p, K, K) -> (K*K, C_out_p, C_in_p): tap ki*K+kj.
    w_taps = w_taps.transpose(2, 3, 0, 1).reshape(K * K, C_out_p, C_in_p).astype(cd)

    q_idx = jnp.arange(Lw_p, dtype=jnp.int32)
    valid = (q_idx < Lw) & ((q_idx % Wp) < Wo)
    mask = valid.astype(jnp.float32).reshape(1, Lw_p)

    # gamma/beta zero-padded: padded channels get var=0 -> scale=0*rsqrt(eps)=0,
    # shift=0, so they stay exactly zero and are sliced off (kept invariant).
    gamma_p = jnp.pad(gamma.astype(jnp.float32).reshape(-1), (0, C_out_p - C_out))
    beta_p = jnp.pad(beta.astype(jnp.float32).reshape(-1), (0, C_out_p - C_out))

    # ---------------- pass 1 ----------------
    kernel1 = _make_conv_stats_kernel(K, Wp)
    y_wide, part = pl.pallas_call(
        kernel1,
        grid=(N, T1),
        in_specs=[
            pl.BlockSpec((None, C_in_p, tile_q), lambda n, t: (n, 0, t)),
            pl.BlockSpec((None, C_in_p, tile_q), lambda n, t: (n, 0, t + 1)),
            pl.BlockSpec((K * K, C_out_p, C_in_p), lambda n, t: (0, 0, 0)),
            pl.BlockSpec((1, tile_q), lambda n, t: (0, t)),
        ],
        out_specs=[
            pl.BlockSpec((None, C_out_p, tile_q), lambda n, t: (n, 0, t)),
            pl.BlockSpec((None, C_out_p, 2), lambda n, t: (n, 0, 0)),
        ],
        out_shape=[
            jax.ShapeDtypeStruct((N, C_out_p, Lw_p), cd),
            jax.ShapeDtypeStruct((N, C_out_p, 2), jnp.float32),
        ],
        scratch_shapes=[pltpu.VMEM((C_out_p, 2), jnp.float32)],
        compiler_params=pltpu.CompilerParams(
            dimension_semantics=("parallel", "arbitrary"),
            vmem_limit_bytes=vmem_limit),
        cost_estimate=pl.CostEstimate(
            flops=2 * N * Lw_p * C_in_p * K * K * C_out_p,
            transcendentals=0,
            bytes_accessed=(2 * N * C_in_p * Lw_p * ce
                            + K * K * C_out_p * C_in_p * ce
                            + N * C_out_p * Lw_p * ce
                            + N * C_out_p * 2 * 4 + Lw_p * 4)),
    )(xf, xf, w_taps, mask)

    # ---- glue: fold per-sample partial stats -> per-channel scale/shift -----
    tot = jnp.sum(part, axis=0)                            # (C_out_p, 2)
    cnt = jnp.float32(N * Ho * Wo)
    mean = tot[:, 0] / cnt
    var = jnp.maximum(tot[:, 1] / cnt - mean * mean, 0.0)  # biased (train-mode BN)
    scale = gamma_p * lax.rsqrt(var + EPS)
    shift = beta_p - mean * scale
    a = scale.reshape(C_out_p, 1)
    b = shift.reshape(C_out_p, 1)

    # ---------------- pass 2 (pure streaming; own, larger tile) --------------
    if tile_q2 is None:
        per_q2 = C_out_p * (2 * ce + 2 * 4 + 4) + 8
        tile_q2 = _pick_tile(Lw_p, 128, 4 * C_out_p * 4, int(per_q2 * 1.25), budget)
    assert Lw_p % tile_q2 == 0 and (tile_q2 % 128 == 0 or tile_q2 == Lw_p)
    T2 = Lw_p // tile_q2

    out_wide = pl.pallas_call(
        _bn_relu_kernel,
        grid=(N, T2),
        in_specs=[
            pl.BlockSpec((None, C_out_p, tile_q2), lambda n, t: (n, 0, t)),
            pl.BlockSpec((C_out_p, 1), lambda n, t: (0, 0)),
            pl.BlockSpec((C_out_p, 1), lambda n, t: (0, 0)),
        ],
        out_specs=pl.BlockSpec((None, C_out_p, tile_q2), lambda n, t: (n, 0, t)),
        out_shape=jax.ShapeDtypeStruct((N, C_out_p, Lw_p), jnp.float32),
        compiler_params=pltpu.CompilerParams(
            dimension_semantics=("parallel", "parallel"),
            vmem_limit_bytes=vmem_limit),
        cost_estimate=pl.CostEstimate(
            flops=2 * N * C_out_p * Lw_p,
            transcendentals=0,
            bytes_accessed=N * C_out_p * Lw_p * (ce + 4) + 2 * C_out_p * 4),
    )(y_wide, a, b)

    # Drop padded channels / junk wide columns; single fused XLA slice+reshape.
    out = out_wide[:, :C_out, :Lw].reshape(N, C_out, Ho, Wp)[:, :, :, :Wo]
    return out


def _reference(x, weight, gamma, beta, *, stride=1, padding=1):
    # Pure-JAX reference: conv (no bias) + train-mode BN + ReLU, NCHW.
    y = lax.conv_general_dilated(
        x.astype(jnp.float32), weight.astype(jnp.float32),
        window_strides=(stride, stride),
        padding=[(padding, padding), (padding, padding)],
        dimension_numbers=("NCHW", "OIHW", "NCHW"))
    mean = jnp.mean(y, axis=(0, 2, 3), keepdims=True)
    var = jnp.mean((y - mean) ** 2, axis=(0, 2, 3), keepdims=True)
    y = (y - mean) * lax.rsqrt(var + EPS)
    y = y * gamma.reshape(1, -1, 1, 1) + beta.reshape(1, -1, 1, 1)
    return jnp.maximum(y, 0.0)


if __name__ == "__main__":
    # Small shapes consistent with the module: ConvBlock2d(4, 8, kernel_size=3)
    N, C_in, H, W = 2, 4, 16, 16
    C_out, K, stride, padding = 8, 3, 1, 1

    key = jax.random.PRNGKey(0)
    kx, kw, kg, kb = jax.random.split(key, 4)

    x = jax.random.normal(kx, (N, C_in, H, W), dtype=jnp.float32)
    fan_in = C_in * K * K
    weight = jax.random.normal(kw, (C_out, C_in, K, K), dtype=jnp.float32) / jnp.sqrt(fan_in)
    gamma = 1.0 + 0.1 * jax.random.normal(kg, (C_out,), dtype=jnp.float32)
    beta = 0.1 * jax.random.normal(kb, (C_out,), dtype=jnp.float32)

    ref = jax.block_until_ready(
        _reference(x, weight, gamma, beta, stride=stride, padding=padding))

    # Exact path (f32 through the MXU and f32 y intermediate); tile_q=128
    # forces a multi-tile spatial grid so the cross-tile BN-stat accumulation
    # and the halo (next-tile) reads are exercised and checked tightly.
    out_f32 = jax.block_until_ready(
        conv_block_2d(x, weight, gamma, beta, stride=stride, padding=padding,
                      tile_q=128, tile_q2=128, compute_dtype=jnp.float32))
    np.testing.assert_allclose(np.asarray(out_f32), np.asarray(ref),
                               rtol=2e-4, atol=2e-4)

    # Fast path (bf16 activations/weights/intermediate, f32 MXU accumulation
    # and f32 BN statistics) with auto (VMEM-budget) tile sizes — looser tol.
    out_bf16 = jax.block_until_ready(
        conv_block_2d(x, weight, gamma, beta, stride=stride, padding=padding,
                      compute_dtype=jnp.bfloat16))
    np.testing.assert_allclose(np.asarray(out_bf16), np.asarray(ref),
                               rtol=5e-2, atol=5e-2)

    print("KERNEL_OK")
</pallas_src>

<mosaic_0001>
module attributes {stable_mosaic.version = 11 : i64} {
  func.func @kernel(%arg0: i32, %arg1: i32, %arg2: memref<1x8x128xf32, #tpu.memory_space<vmem>>, %arg3: memref<1x8x128xf32, #tpu.memory_space<vmem>>, %arg4: memref<9x8x8xf32, #tpu.memory_space<vmem>>, %arg5: memref<1x128xf32, #tpu.memory_space<vmem>>, %arg6: memref<1x8x128xf32, #tpu.memory_space<vmem>>, %arg7: memref<1x8x2xf32, #tpu.memory_space<vmem>>, %arg8: memref<8x2xf32, #tpu.memory_space<vmem>>) attributes {dimension_semantics = [#tpu.dimension_semantics<parallel>, #tpu.dimension_semantics<arbitrary>], iteration_bounds = array<i64: 2, 3>, scalar_prefetch = 0 : i64, scratch_operands = 1 : i64, tpu.core_type = #tpu.core_type<tc>, window_params = [{transform_indices = @transform_0, window_bounds = array<i64: 1, 8, 128>}, {transform_indices = @transform_1, window_bounds = array<i64: 1, 8, 128>}, {pipeline_mode = #tpu.pipeline_mode<synchronous>, transform_indices = @transform_2, window_bounds = array<i64: 9, 8, 8>}, {transform_indices = @transform_3, window_bounds = array<i64: 1, 128>}, {transform_indices = @transform_4, window_bounds = array<i64: 1, 8, 128>}, {transform_indices = @transform_5, window_bounds = array<i64: 1, 8, 2>}]} {
    %c0 = arith.constant 0 : index
    %c0_0 = arith.constant 0 : index
    %c0_1 = arith.constant 0 : index
    %0 = vector.load %arg2[%c0, %c0_0, %c0_1] : memref<1x8x128xf32, #tpu.memory_space<vmem>>, vector<1x8x128xf32>
    %1 = vector.shape_cast %0 : vector<1x8x128xf32> to vector<8x128xf32>
    %c0_2 = arith.constant 0 : index
    %c0_3 = arith.constant 0 : index
    %c0_4 = arith.constant 0 : index
    %2 = vector.load %arg3[%c0_2, %c0_3, %c0_4] : memref<1x8x128xf32, #tpu.memory_space<vmem>>, vector<1x8x128xf32>
    %3 = vector.shape_cast %2 : vector<1x8x128xf32> to vector<8x128xf32>
    %4 = tpu.concatenate %1, %3 in 1 : vector<8x128xf32>, vector<8x128xf32> -> vector<8x256xf32>
    %5 = vector.extract_strided_slice %4 {offsets = [0, 0], sizes = [8, 128], strides = [1, 1]} : vector<8x256xf32> to vector<8x128xf32>
    %c0_5 = arith.constant 0 : index
    %c0_6 = arith.constant 0 : index
    %c0_7 = arith.constant 0 : index
    %6 = vector.load %arg4[%c0_5, %c0_6, %c0_7] : memref<9x8x8xf32, #tpu.memory_space<vmem>>, vector<1x8x8xf32>
    %7 = vector.shape_cast %6 : vector<1x8x8xf32> to vector<8x8xf32>
    %cst = arith.constant dense<0.000000e+00> : vector<8x128xf32>
    %8 = tpu.matmul %7, %5, %cst {dimension_numbers = #tpu.dot_dimension_numbers<[1], [0], [0], [1], [0, 0, 1, 1], [], []>} : vector<8x8xf32>, vector<8x128xf32>, vector<8x128xf32> -> vector<8x128xf32>
    %9 = vector.extract_strided_slice %4 {offsets = [0, 1], sizes = [8, 128], strides = [1, 1]} : vector<8x256xf32> to vector<8x128xf32>
    %c1 = arith.constant 1 : index
    %c0_8 = arith.constant 0 : index
    %c0_9 = arith.constant 0 : index
    %10 = vector.load %arg4[%c1, %c0_8, %c0_9] : memref<9x8x8xf32, #tpu.memory_space<vmem>>, vector<1x8x8xf32>
    %11 = vector.shape_cast %10 : vector<1x8x8xf32> to vector<8x8xf32>
    %cst_10 = arith.constant dense<0.000000e+00> : vector<8x128xf32>
    %12 = tpu.matmul %11, %9, %cst_10 {dimension_numbers = #tpu.dot_dimension_numbers<[1], [0], [0], [1], [0, 0, 1, 1], [], []>} : vector<8x8xf32>, vector<8x128xf32>, vector<8x128xf32> -> vector<8x128xf32>
    %13 = arith.addf %8, %12 : vector<8x128xf32>
    %14 = vector.extract_strided_slice %4 {offsets = [0, 2], sizes = [8, 128], strides = [1, 1]} : vector<8x256xf32> to vector<8x128xf32>
    %c2 = arith.constant 2 : index
    %c0_11 = arith.constant 0 : index
    %c0_12 = arith.constant 0 : index
    %15 = vector.load %arg4[%c2, %c0_11, %c0_12] : memref<9x8x8xf32, #tpu.memory_space<vmem>>, vector<1x8x8xf32>
    %16 = vector.shape_cast %15 : vector<1x8x8xf32> to vector<8x8xf32>
    %cst_13 = arith.constant dense<0.000000e+00> : vector<8x128xf32>
    %17 = tpu.matmul %16, %14, %cst_13 {dimension_numbers = #tpu.dot_dimension_numbers<[1], [0], [0], [1], [0, 0, 1, 1], [], []>} : vector<8x8xf32>, vector<8x128xf32>, vector<8x128xf32> -> vector<8x128xf32>
    %18 = arith.addf %13, %17 : vector<8x128xf32>
    %19 = vector.extract_strided_slice %4 {offsets = [0, 18], sizes = [8, 128], strides = [1, 1]} : vector<8x256xf32> to vector<8x128xf32>
    %c3 = arith.constant 3 : index
    %c0_14 = arith.constant 0 : index
    %c0_15 = arith.constant 0 : index
    %20 = vector.load %arg4[%c3, %c0_14, %c0_15] : memref<9x8x8xf32, #tpu.memory_space<vmem>>, vector<1x8x8xf32>
    %21 = vector.shape_cast %20 : vector<1x8x8xf32> to vector<8x8xf32>
    %cst_16 = arith.constant dense<0.000000e+00> : vector<8x128xf32>
    %22 = tpu.matmul %21, %19, %cst_16 {dimension_numbers = #tpu.dot_dimension_numbers<[1], [0], [0], [1], [0, 0, 1, 1], [], []>} : vector<8x8xf32>, vector<8x128xf32>, vector<8x128xf32> -> vector<8x128xf32>
    %23 = arith.addf %18, %22 : vector<8x128xf32>
    %24 = vector.extract_strided_slice %4 {offsets = [0, 19], sizes = [8, 128], strides = [1, 1]} : vector<8x256xf32> to vector<8x128xf32>
    %c4 = arith.constant 4 : index
    %c0_17 = arith.constant 0 : index
    %c0_18 = arith.constant 0 : index
    %25 = vector.load %arg4[%c4, %c0_17, %c0_18] : memref<9x8x8xf32, #tpu.memory_space<vmem>>, vector<1x8x8xf32>
    %26 = vector.shape_cast %25 : vector<1x8x8xf32> to vector<8x8xf32>
    %cst_19 = arith.constant dense<0.000000e+00> : vector<8x128xf32>
    %27 = tpu.matmul %26, %24, %cst_19 {dimension_numbers = #tpu.dot_dimension_numbers<[1], [0], [0], [1], [0, 0, 1, 1], [], []>} : vector<8x8xf32>, vector<8x128xf32>, vector<8x128xf32> -> vector<8x128xf32>
    %28 = arith.addf %23, %27 : vector<8x128xf32>
    %29 = vector.extract_strided_slice %4 {offsets = [0, 20], sizes = [8, 128], strides = [1, 1]} : vector<8x256xf32> to vector<8x128xf32>
    %c5 = arith.constant 5 : index
    %c0_20 = arith.constant 0 : index
    %c0_21 = arith.constant 0 : index
    %30 = vector.load %arg4[%c5, %c0_20, %c0_21] : memref<9x8x8xf32, #tpu.memory_space<vmem>>, vector<1x8x8xf32>
    %31 = vector.shape_cast %30 : vector<1x8x8xf32> to vector<8x8xf32>
    %cst_22 = arith.constant dense<0.000000e+00> : vector<8x128xf32>
    %32 = tpu.matmul %31, %29, %cst_22 {dimension_numbers = #tpu.dot_dimension_numbers<[1], [0], [0], [1], [0, 0, 1, 1], [], []>} : vector<8x8xf32>, vector<8x128xf32>, vector<8x128xf32> -> vector<8x128xf32>
    %33 = arith.addf %28, %32 : vector<8x128xf32>
    %34 = vector.extract_strided_slice %4 {offsets = [0, 36], sizes = [8, 128], strides = [1, 1]} : vector<8x256xf32> to vector<8x128xf32>
    %c6 = arith.constant 6 : index
    %c0_23 = arith.constant 0 : index
    %c0_24 = arith.constant 0 : index
    %35 = vector.load %arg4[%c6, %c0_23, %c0_24] : memref<9x8x8xf32, #tpu.memory_space<vmem>>, vector<1x8x8xf32>
    %36 = vector.shape_cast %35 : vector<1x8x8xf32> to vector<8x8xf32>
    %cst_25 = arith.constant dense<0.000000e+00> : vector<8x128xf32>
    %37 = tpu.matmul %36, %34, %cst_25 {dimension_numbers = #tpu.dot_dimension_numbers<[1], [0], [0], [1], [0, 0, 1, 1], [], []>} : vector<8x8xf32>, vector<8x128xf32>, vector<8x128xf32> -> vector<8x128xf32>
    %38 = arith.addf %33, %37 : vector<8x128xf32>
    %39 = vector.extract_strided_slice %4 {offsets = [0, 37], sizes = [8, 128], strides = [1, 1]} : vector<8x256xf32> to vector<8x128xf32>
    %c7 = arith.constant 7 : index
    %c0_26 = arith.constant 0 : index
    %c0_27 = arith.constant 0 : index
    %40 = vector.load %arg4[%c7, %c0_26, %c0_27] : memref<9x8x8xf32, #tpu.memory_space<vmem>>, vector<1x8x8xf32>
    %41 = vector.shape_cast %40 : vector<1x8x8xf32> to vector<8x8xf32>
    %cst_28 = arith.constant dense<0.000000e+00> : vector<8x128xf32>
    %42 = tpu.matmul %41, %39, %cst_28 {dimension_numbers = #tpu.dot_dimension_numbers<[1], [0], [0], [1], [0, 0, 1, 1], [], []>} : vector<8x8xf32>, vector<8x128xf32>, vector<8x128xf32> -> vector<8x128xf32>
    %43 = arith.addf %38, %42 : vector<8x128xf32>
    %44 = vector.extract_strided_slice %4 {offsets = [0, 38], sizes = [8, 128], strides = [1, 1]} : vector<8x256xf32> to vector<8x128xf32>
    %c8 = arith.constant 8 : index
    %c0_29 = arith.constant 0 : index
    %c0_30 = arith.constant 0 : index
    %45 = vector.load %arg4[%c8, %c0_29, %c0_30] : memref<9x8x8xf32, #tpu.memory_space<vmem>>, vector<1x8x8xf32>
    %46 = vector.shape_cast %45 : vector<1x8x8xf32> to vector<8x8xf32>
    %cst_31 = arith.constant dense<0.000000e+00> : vector<8x128xf32>
    %47 = tpu.matmul %46, %44, %cst_31 {dimension_numbers = #tpu.dot_dimension_numbers<[1], [0], [0], [1], [0, 0, 1, 1], [], []>} : vector<8x8xf32>, vector<8x128xf32>, vector<8x128xf32> -> vector<8x128xf32>
    %48 = arith.addf %43, %47 : vector<8x128xf32>
    %c0_32 = arith.constant 0 : index
    %c0_33 = arith.constant 0 : index
    %c0_34 = arith.constant 0 : index
    %49 = vector.load %arg6[%c0_32, %c0_33, %c0_34] : memref<1x8x128xf32, #tpu.memory_space<vmem>>, vector<1x8x128xf32>
    %50 = vector.shape_cast %49 : vector<1x8x128xf32> to vector<8x128xf32>
    %51 = vector.shape_cast %48 : vector<8x128xf32> to vector<1x8x128xf32>
    tpu.vector_store %arg6[%c0_32, %c0_33, %c0_34], %51 {strides = array<i32>} : memref<1x8x128xf32, #tpu.memory_space<vmem>>, vector<1x8x128xf32>,
    %c0_35 = arith.constant 0 : index
    %c0_36 = arith.constant 0 : index
    %52 = vector.load %arg5[%c0_35, %c0_36] : memref<1x128xf32, #tpu.memory_space<vmem>>, vector<1x128xf32>
    %53 = vector.broadcast %52 : vector<1x128xf32> to vector<8x128xf32>
    %54 = arith.mulf %48, %53 : vector<8x128xf32>
    %cst_37 = arith.constant dense<0.000000e+00> : vector<8xf32>
    %55 = vector.multi_reduction <add>, %54, %cst_37 [1] : vector<8x128xf32> to vector<8xf32>
    %56 = vector.shape_cast %55 : vector<8xf32> to vector<8x1xf32>
    %57 = arith.mulf %54, %54 : vector<8x128xf32>
    %cst_38 = arith.constant dense<0.000000e+00> : vector<8xf32>
    %58 = vector.multi_reduction <add>, %57, %cst_38 [1] : vector<8x128xf32> to vector<8xf32>
    %59 = vector.shape_cast %58 : vector<8xf32> to vector<8x1xf32>
    %60 = tpu.concatenate %56, %59 in 1 : vector<8x1xf32>, vector<8x1xf32> -> vector<8x2xf32>
    %c0_i32 = arith.constant 0 : i32
    %61 = arith.cmpi eq, %arg1, %c0_i32 : i32
    %62 = arith.extui %61 : i1 to i32
    %c0_i32_39 = arith.constant 0 : i32
    %63 = arith.cmpi ne, %62, %c0_i32_39 : i32
    scf.if %63 {
      %cst_45 = arith.constant 0.000000e+00 : f32
      %70 = vector.broadcast %cst_45 : f32 to vector<8x2xf32>
      %c0_46 = arith.constant 0 : index
      %c0_47 = arith.constant 0 : index
      %71 = vector.load %arg8[%c0_46, %c0_47] : memref<8x2xf32, #tpu.memory_space<vmem>>, vector<8x2xf32>
      tpu.vector_store %arg8[%c0_46, %c0_47], %70 {strides = array<i32>} : memref<8x2xf32, #tpu.memory_space<vmem>>, vector<8x2xf32>,
    } else {
    }
    %c0_40 = arith.constant 0 : index
    %c0_41 = arith.constant 0 : index
    %64 = vector.load %arg8[%c0_40, %c0_41] : memref<8x2xf32, #tpu.memory_space<vmem>>, vector<8x2xf32>
    %65 = arith.addf %64, %60 : vector<8x2xf32>
    %c0_42 = arith.constant 0 : index
    %c0_43 = arith.constant 0 : index
    %66 = vector.load %arg8[%c0_42, %c0_43] : memref<8x2xf32, #tpu.memory_space<vmem>>, vector<8x2xf32>
    tpu.vector_store %arg8[%c0_42, %c0_43], %65 {strides = array<i32>} : memref<8x2xf32, #tpu.memory_space<vmem>>, vector<8x2xf32>,
    %c2_i32 = arith.constant 2 : i32
    %67 = arith.cmpi eq, %arg1, %c2_i32 : i32
    %68 = arith.extui %67 : i1 to i32
    %c0_i32_44 = arith.constant 0 : i32
    %69 = arith.cmpi ne, %68, %c0_i32_44 : i32
    scf.if %69 {
      %c0_45 = arith.constant 0 : index
      %c0_46 = arith.constant 0 : index
      %70 = vector.load %arg8[%c0_45, %c0_46] : memref<8x2xf32, #tpu.memory_space<vmem>>, vector<8x2xf32>
      %c0_47 = arith.constant 0 : index
      %c0_48 = arith.constant 0 : index
      %c0_49 = arith.constant 0 : index
      %71 = vector.load %arg7[%c0_47, %c0_48, %c0_49] : memref<1x8x2xf32, #tpu.memory_space<vmem>>, vector<1x8x2xf32>
      %72 = vector.shape_cast %71 : vector<1x8x2xf32> to vector<8x2xf32>
      %73 = vector.shape_cast %70 : vector<8x2xf32> to vector<1x8x2xf32>
      tpu.vector_store %arg7[%c0_47, %c0_48, %c0_49], %73 {strides = array<i32>} : memref<1x8x2xf32, #tpu.memory_space<vmem>>, vector<1x8x2xf32>,
    } else {
    }
    return
  }
  func.func @transform_0(%arg0: i32, %arg1: i32) -> (i32, i32, i32) {
    %c0_i32 = arith.constant 0 : i32
    %c0_i32_0 = arith.constant 0 : i32
    return %arg0, %c0_i32, %arg1 : i32, i32, i32
  }
  func.func @transform_1(%arg0: i32, %arg1: i32) -> (i32, i32, i32) {
    %c1_i32 = arith.constant 1 : i32
    %0 = arith.addi %arg1, %c1_i32 : i32
    %c0_i32 = arith.constant 0 : i32
    %c0_i32_0 = arith.constant 0 : i32
    return %arg0, %c0_i32, %0 : i32, i32, i32
  }
  func.func @transform_2(%arg0: i32, %arg1: i32) -> (i32, i32, i32) {
    %c0_i32 = arith.constant 0 : i32
    %c0_i32_0 = arith.constant 0 : i32
    %c0_i32_1 = arith.constant 0 : i32
    %c0_i32_2 = arith.constant 0 : i32
    return %c0_i32, %c0_i32_0, %c0_i32_1 : i32, i32, i32
  }
  func.func @transform_3(%arg0: i32, %arg1: i32) -> (i32, i32) {
    %c0_i32 = arith.constant 0 : i32
    %c0_i32_0 = arith.constant 0 : i32
    return %c0_i32, %arg1 : i32, i32
  }
  func.func @transform_4(%arg0: i32, %arg1: i32) -> (i32, i32, i32) {
    %c0_i32 = arith.constant 0 : i32
    %c0_i32_0 = arith.constant 0 : i32
    return %arg0, %c0_i32, %arg1 : i32, i32, i32
  }
  func.func @transform_5(%arg0: i32, %arg1: i32) -> (i32, i32, i32) {
    %c0_i32 = arith.constant 0 : i32
    %c0_i32_0 = arith.constant 0 : i32
    %c0_i32_1 = arith.constant 0 : i32
    return %arg0, %c0_i32, %c0_i32_0 : i32, i32, i32
  }
}

</mosaic_0001>

<bundles_post_ra>
// kernel: tpu_custom_call.1
= control target key start
LH: loop header
LB: loop body
LE: loop exit
PB: predicated region body
PF: predicated region fallthrough
CT: control target
= control target key end

     0   :  { %11 = vsyncpa [#allocation4], 0  ;;  %s1259_s0 = inlined_call_operand.vmem [shape: f32[2,8,512], index: 0, kind: input, shape index: {}]   ;;  %s1260_s1 = inlined_call_operand.vmem [shape: f32[2,8,512], index: 1, kind: input, shape index: {}]   ;;  %s1261_s2 = inlined_call_operand.vmem [shape: f32[9,8,8], index: 2, kind: input, shape index: {}]   ;;  %s1262_s3 = inlined_call_operand.vmem [shape: f32[1,384], index: 3, kind: input, shape index: {}]   ;;  %s1263_s4 = inlined_call_operand.hbm [shape: f32[2,8,384], index: 4, kind: output, shape index: {0}]   ;;  %s1264_s5 = inlined_call_operand.vmem [shape: f32[2,8,2], index: 5, kind: output, shape index: {1}]  }
   0x1   :  { %13 = vsyncpa [#allocation4 + $0x1], 0  ;;  %s1077_s18 = smov 0   ;;  %s1079_s19 = smov 0  }
   0x2   :  { %s1081_s20 = smov 0   ;;  %s1083_s21 = smov 0  }
   0x3   :  { %s1085_s22 = smov 0   ;;  %s1087_s23 = smov 0  }
   0x4   :  { %s1089_s24 = smov 0   ;;  %s1091_s25 = smov 0  }
   0x5 LB: > { %1269 = sst [smem:[#allocation6_spill]] %s1028_s23  ;;  %s786_s26 = sadd.s32 4294967295, %s1036_s25   ;;  %s1036_s25 = sphi %s1091_s25, %s19_s25   ;;  %s1032_s24 = sphi %s1089_s24, %s1280_s24   ;;  %s1028_s23 = sphi %s1087_s23, %s1279_s23   ;;  %s1024_s22 = sphi %s1085_s22, %s1278_s22   ;;  %s1020_s21 = sphi %s1083_s21, %s1277_s21   ;;  %s1016_s20 = sphi %s1081_s20, %s1283_s20   ;;  %s1012_s19 = sphi %s1079_s19, %s1282_s19   ;;  %s1008_s18 = sphi %s1077_s18, %s1281_s18  }
   0x6   : > { %1270 = sst [smem:[#allocation7_spill]] %s1032_s24  ;;  %s787_s27 = sadd.s32 4294967294, %s1036_s25  }
   0x7   : > { %s28_s28 = sadd.s32 1, %s1028_s23  ;;  %s31_s29 = sadd.s32 1, %s1032_s24 }
   0x8   : > { %p29_p0 = scmp.ge.s32.totalorder %s28_s28, 3  ;;  %p155_p1 = scmp.ne.s32.totalorder %s1016_s20, %s1012_s19 }
   0x9   : > { %p156_p2 = scmp.eq.s32.totalorder %s786_s26, 5  ;;  %p161_p5 = scmp.ne.s32.totalorder %s1012_s19, %s1008_s18 }
   0xa   : > { %s1285_s28 = smov (%p29_p0, %s28_s28), 0  ;;  %s1287_s29 = smov (!%p29_p0, %s31_s29), %s1032_s24 }
   0xb   : > { %1271 = sst [smem:[#allocation8_spill]] %s1285_s28  ;;  %s141_s30 = ssub.s32 %s1028_s23, %s1285_s28 }
   0xc   : > { %p1128_p3 = por %p156_p2, %p155_p1  ;;  %p33_p4 = scmp.ge.s32.totalorder %s1287_s29, 2 }
   0xd   : > { %p162_p6 = scmp.eq.s32.totalorder %s787_s27, 5  ;;  %p790_p7 = scmp.ge.s32.totalorder %s1036_s25, 1 }
   0xe   : > { %s1289_s29 = smov (%p33_p4, %s1287_s29), 0  ;;  %p239_p9 = scmp.lt.s32.totalorder %s1036_s25, 7 }
   0xf   : > { %1273 = sst [smem:[#allocation9_spill]] %s1289_s29  ;;  %p1137_p8 = por %p162_p6, %p161_p5 }
  0x10   : > { %s140_s8 = ssub.s32 %s1032_s24, %s1289_s29  ;;  %s145_s9 = sadd.s32 1, %s1016_s20 }
  0x11   : > { %s142_s10 = sor.u32 %s141_s30, %s140_s8  ;;  %p240_p10 = pnand %p790_p7, %p239_p9 }
  0x12   : > { %p143_p11 = scmp.eq.s32.totalorder %s142_s10, 0  ;;  %p286_p12 = scmp.lt.s32.totalorder (!%p240_p10), %s1024_s22, 1 }
  0x13   : > { %243 = sbr.rel (%p240_p10) target bundleno = 465 (0x1d1), region = 36  ;;  %p288_p13 = scmp.lt.s32.totalorder (!%p240_p10), %s1020_s21, 3 }
  0x14   : > { %s1146_s11 = scalar_select %p143_p11, %s1016_s20, %s145_s9  }
  0x15   : > { %s294_s12 = sadd.s32 (!%p240_p10), 1, %s1020_s21  ;;  %s1041_s27 = smov (!%p240_p10), 127  }
  0x16   : > { %1275 = sst [smem:[#allocation10_spill]] %s1146_s11  ;;  %p297_p0 = scmp.lt.s32.totalorder (!%p240_p10), %s294_s12, 3 }
  0x17   : > { %p304_p1 = scmp.lt.s32.totalorder (!%p240_p10), %s1020_s21, 2  ;;  %s277_s10 = sand.u32 (!%p240_p10), 1, %s1012_s19  }
  0x18   : > { %s287_s13 = scalar_select %p286_p12, %s1024_s22, 1  ;;  %vm325_vm0 = vcmask 64512   ;;  %v313_v3 = vld [vmem:[%s1261_s2] sm:$0xff]  ;;  %vm378_vm1 = vcmask 1031168   ;;  %vm411_vm2 = vcmask 900096   ;;  %vm543_vm3 = vcmask 744448  }
  0x19   : > { %s289_s14 = scalar_select %p288_p13, %s1020_s21, 3  ;;  %v800_v14 = vld [vmem:[%s1261_s2 + $0x10] sm:$0xff]  ;;  %v802_v15 = vld [vmem:[%s1261_s2 + $0x18] sm:$0xff]  ;;  %vm444_vm4 = vcmask 891904   ;;  %vm322_vm5 = vcmask 1039360   ;;  %vm510_vm6 = vcmask 752640  }
  0x1a   : > { %s792_s15 = sshll.u32 %s287_s13, 2  ;;  %s796_s17 = sshll.u32 %s287_s13, 3  ;;  %v808_v28 = vld [vmem:[%s1261_s2 + $0x30] sm:$0xff]  ;;  %v797_v30 = vld [vmem:[%s1261_s2 + $0x8] sm:$0xff]  ;;  %v810_v32 = vld [vmem:[%s1261_s2 + $0x38] sm:$0xff]  ;;  %vm477_vm7 = vcmask 883712  }
  0x1b   : > { %s291_s16 = sadd.s32 %s792_s15, %s289_s14  ;;  %s1156_s8 = scalar_lea.vmem %s1264_s5, %s796_s17  ;;  %vm576_vm8 = vcmask 736256   ;;  %v806_v39 = vld [vmem:[%s1261_s2 + $0x28] sm:$0xff]  ;;  %v804_v41 = vld [vmem:[%s1261_s2 + $0x20] sm:$0xff]  ;;  %vm614_vm9 = vcmask 7168  }
  0x1c   : > { %s793_s26 = sshll.u32 %s291_s16, 3  ;;  %s1291_s12 = smov (!%p297_p0, %s294_s12), 3  ;;  %v812_v43 = vld [vmem:[%s1261_s2 + $0x40] sm:$0xff] }
  0x1d   : > { %s293_s29 = scalar_lea.vmem %s1259_s0, %s793_s26  ;;  %s300_s28 = sadd.s32 %s792_s15, %s1291_s12 }
  0x1e   : > { %v311_v0 = vld [vmem:[%s293_s29] sm:$0xff]  ;;  %s795_s24 = sshll.u32 %s300_s28, 3  ;;  %s1038_s13 = smov 126  }
  0x1f   : > { %367 = vmatpush.msra.mxu1 %v311_v0  ;;  %s302_s14 = scalar_lea.vmem %s1260_s1, %s795_s24  ;;  %s1039_s16 = smov 110  }
  0x20   : > { %v312_v1 = vld [vmem:[%s302_s14] sm:$0xff]  ;;  %s1040_s17 = smov 109   ;;  %s1042_s26 = smov 92   ;;  %799 = vmatmul.msk.f32.vlgmr.msra.gmra.mxu1 %vm325_vm0, %v313_v3 }
  0x21   : > { %v901_v2 = vpack.i.bf16 %v312_v1, %v311_v0  ;;  %s1043_s29 = smov 91   ;;  %s1044_s12 = smov 108  }
  0x22   : > { %s1045_s28 = smov 90   ;;  %s1208_s14 = sshll.u32 %s277_s10, 3 }
  0x23   : > { %902 = vrot.lane.b32.xlu0 %v901_v2, %s1038_s13  ;;  %912 = vrot.lane.b32.xlu1 %v901_v2, %s1039_s16  ;;  %s305_s23 = scalar_select %p304_p1, %s1020_s21, 2 }
  0x24   : > { %922 = vrot.lane.b32.xlu2 %v901_v2, %s1040_s17  ;;  %s279_s13 = scalar_lea.vmem [#allocation3], %s1208_s14  ;;  %p814_p2 = scmp.ne.s32.totalorder %s1020_s21, 0 }
  0x25   : > { %s306_s9 = scalar_lea.vmem %s1262_s3, %s305_s23 }
  0x26   : > { %v941_v59 = vld [vmem:[%s306_s9] ss:$0 sm:$0xff] }
  0x2b   : > { %907 = vrot.lane.b32.xlu0 %v901_v2, %s1041_s27  ;;  %917 = vrot.lane.b32.xlu1 %v901_v2, %s1042_s26 }
  0x2c   : > { %927 = vrot.lane.b32.xlu2 %v901_v2, %s1043_s29 }
  0x33   : > { %932 = vrot.lane.b32.xlu0 %v901_v2, %s1044_s12  ;;  %937 = vrot.lane.b32.xlu1 %v901_v2, %s1045_s28 }
  0x7e   : > { %v923_v4 = vpop.permute.xlu2 %922 }
  0x7f   : > { %v925_v19 = vunpack.i.h.bf16 %v923_v4  ;;  %v924_v20 = vunpack.i.l.bf16 %v923_v4 }
  0x81   : > { %v445_v27 = vsel %vm444_vm4, %v924_v20, %v925_v19 }
  0x86   : > { %v928_v5 = vpop.permute.xlu2 %927 }
  0x87   : > { %v930_v6 = vunpack.i.h.bf16 %v928_v5  ;;  %v929_v7 = vunpack.i.l.bf16 %v928_v5 }
  0x89   : > { %v544_v18 = vsel %vm543_vm3, %v929_v7, %v930_v6 }
  0x95   : > { %v903_v8 = vpop.permute.xlu0 %902  ;;  %v913_v9 = vpop.permute.xlu1 %912 }
  0x96   : > { %v905_v10 = vunpack.i.h.bf16 %v903_v8  ;;  %v904_v11 = vunpack.i.l.bf16 %v903_v8  ;;  %v915_v12 = vunpack.i.h.bf16 %v913_v9  ;;  %v914_v13 = vunpack.i.l.bf16 %v913_v9 }
  0x98   : > { %v379_v16 = vsel %vm378_vm1, %v904_v11, %v905_v10  ;;  %v412_v17 = vsel %vm411_vm2, %v914_v13, %v915_v12 }
  0x99   : > { %399 = vmatpush.msra.mxu2 %v379_v16  ;;  %432 = vmatpush.msra.mxu3 %v412_v17 }
  0x9a   : > { %801 = vmatmul.msk.f32.vlgmr.msra.gmra.mxu2 %vm325_vm0, %v800_v14  ;;  %803 = vmatmul.msk.f32.vlgmr.msra.gmra.mxu3 %vm325_vm0, %v802_v15 }
  0x9b   : > { %564 = vmatpush.msrb.mxu3 %v544_v18 }
  0x9d   : > { %v908_v21 = vpop.permute.xlu0 %907  ;;  %v918_v22 = vpop.permute.xlu1 %917 }
  0x9e   : > { %v910_v23 = vunpack.i.h.bf16 %v908_v21  ;;  %v909_v24 = vunpack.i.l.bf16 %v908_v21  ;;  %v920_v25 = vunpack.i.h.bf16 %v918_v22  ;;  %v919_v26 = vunpack.i.l.bf16 %v918_v22  ;;  %v369_v44 = vpop.f32.mrf.mxu1 }
  0xa0   : > { %v323_v29 = vsel %vm322_vm5, %v909_v24, %v910_v23  ;;  %v511_v31 = vsel %vm510_vm6, %v919_v26, %v920_v25 }
  0xa1   : > { %344 = vmatpush.msra.mxu0 %v323_v29  ;;  %531 = vmatpush.msrb.mxu2 %v511_v31 }
  0xa2   : > { %809 = vmatmul.msk.f32.vlgmr.msrb.gmra.mxu2 %vm325_vm0, %v808_v28  ;;  %798 = vmatmul.msk.f32.vlgmr.msra.gmra.mxu0 %vm325_vm0, %v797_v30 }
  0xa3   : > { %465 = vmatpush.msrb.mxu0 %v445_v27  ;;  %811 = vmatmul.msk.f32.vlgmr.msrb.gmra.mxu3 %vm325_vm0, %v810_v32 }
  0xa5   : > { %v933_v33 = vpop.permute.xlu0 %932  ;;  %v938_v34 = vpop.permute.xlu1 %937 }
  0xa6   : > { %v935_v35 = vunpack.i.h.bf16 %v933_v33  ;;  %v934_v36 = vunpack.i.l.bf16 %v933_v33  ;;  %v940_v37 = vunpack.i.h.bf16 %v938_v34  ;;  %v939_v38 = vunpack.i.l.bf16 %v938_v34 }
  0xa8   : > { %v478_v40 = vsel %vm477_vm7, %v934_v36, %v935_v35  ;;  %v577_v42 = vsel %vm576_vm8, %v939_v38, %v940_v37 }
  0xa9   : > { %498 = vmatpush.msrb.mxu1 %v478_v40  ;;  %597 = vmatpush.msra.mxu0 %v577_v42 }
  0xaa   : > { %807 = vmatmul.msk.f32.vlgmr.msrb.gmra.mxu1 %vm325_vm0, %v806_v39  ;;  %805 = vmatmul.msk.f32.vlgmr.msrb.gmra.mxu0 %vm325_vm0, %v804_v41 }
  0xb2   : > { %813 = vmatmul.msk.f32.vlgmr.msra.gmra.mxu0 %vm325_vm0, %v812_v43 }
 0x11d   : > { %v401_v46 = vpop.f32.mrf.mxu2  ;;  %v434_v49 = vpop.f32.mrf.mxu3 }
 0x11f   : > { %v346_v45 = vpop.f32.mrf.mxu0 }
 0x120   : > { %v370_v47 = vadd.f32 %v369_v44, %v346_v45 }
 0x122   : > { %v404_v48 = vadd.f32 %v401_v46, %v370_v47 }
 0x124   : > { %v437_v50 = vadd.f32 %v434_v49, %v404_v48 }
 0x125   : > { %v533_v54 = vpop.f32.mrf.mxu2 }
 0x126   : > { %v566_v56 = vpop.f32.mrf.mxu3 }
 0x127   : > { %v467_v51 = vpop.f32.mrf.mxu0  ;;  %v500_v52 = vpop.f32.mrf.mxu1 }
 0x128   : > { %v470_v53 = vadd.f32 %v467_v51, %v437_v50 }
 0x12a   : > { %v503_v55 = vadd.f32 %v500_v52, %v470_v53 }
 0x12c   : > { %v536_v57 = vadd.f32 %v533_v54, %v503_v55 }
 0x12e   : > { %v569_v58 = vadd.f32 %v566_v56, %v536_v57 }
 0x12f   : > { %v599_v60 = vpop.f32.mrf.mxu0 }
 0x130   : > { %v602_v61 = vadd.f32 %v599_v60, %v569_v58 }
 0x132   : > { %603 = vst [vmem:[%s279_s13] sm:$0xff] %v602_v61  ;;  %v608_v62 = vmul.f32 %v941_v59, %v602_v61 }
 0x134   : > { %609 = vadd.xlane.f32.xlu2 %v608_v62  ;;  %v611_v63 = vmul.f32 %v608_v62, %v608_v62 }
 0x136   : > { %612 = vadd.xlane.f32.xlu0 %v611_v63 }
 0x1a6   : > { %619 = sbr.rel (%p814_p2) target bundleno = 429 (0x1ad), region = 40 }
 0x1a7   : > { %v610_v0 = vpop.xlane.xlu2 %609 }
 0x1a9   : > { %v613_v1 = vpop.xlane.xlu0 %612 }
 0x1aa   : > { %v615_v2 = vsel %vm614_vm9, %v610_v0, %v613_v1 }
 0x1ab   : > { %vm620_vm10 = vcmask 15360   ;;  %v1046_v3 = vmov 0.0  }
 0x1ac   : > { %621 = vst.msk [vmem:[#allocation2] sm:$0xff] %vm620_vm10, %v1046_v3 }
 0x1ad PF: > { %vm624_vm11 = vcmask 15360   ;;  %p815_p4 = scmp.ne.s32.totalorder %s1020_s21, 2 }
 0x1b2   : > { %629 = sbr.rel (%p815_p4) target bundleno = 447 (0x1bf), region = 44 }
 0x1b3   : > { %v622_v4 = vld [vmem:[#allocation2] sm:$0xff] }
 0x1b4   : > { %v623_v5 = vadd.f32 %v622_v4, %v615_v2 }
 0x1b6   : > { %625 = vst.msk [vmem:[#allocation2] sm:$0xff] %vm624_vm11, %v623_v5 }
 0x1bd   : > { %v630_v6 = vld [vmem:[#allocation2] sm:$0xff] }
 0x1be   : > { %631 = vst.msk [vmem:[%s1156_s8] sm:$0xff] %vm624_vm11, %v630_v6 }
 0x1bf PF: > { %s820_s16 = smul.u32 3, %s1024_s22  ;;  %s651_s17 = sshll.u32 %s279_s13, 4  ;;  %s652_s17 = int_to_ptr.vmem [resolvable:$true] %s651_s17 }
 0x1c0   : > { %s633_s24 = scalar_lea.sflag [#allocation4], %s277_s10 }
 0x1c1   : > { %s647_s27 = sadd.s32 %s1020_s21, %s820_s16  ;;  %s962_s21 = scalar_lea.hbm %s1263_s4, 48 }
 0x1c2   : > { %s817_s26 = sshll.u32 %s647_s27, 3 }
 0x1c3   : > { %s649_s28 = scalar_lea.hbm %s1263_s4, %s817_s26 }
 0x1c4   : > { %s653_s23 = sshll.u32 %s649_s28, 4  ;;  %s654_s23 = int_to_ptr.hbm [resolvable:$true] %s653_s23 }
 0x1c5   : > { %s956_s11 = sshra.s32 %s654_s23, 4  ;;  %s957_s11 = int_to_ptr.hbm [resolvable:$true] %s956_s11 }
 0x1c6   : > { %s958_s8 = scalar_lea.hbm %s957_s11, 8  ;;  %p963_p9 = scmp.lt.s32.totalorder %s957_s11, %s1263_s4 }
 0x1c7   : > { %p959_p5 = scmp.ne.s32.totalorder %s957_s11, %s958_s8  ;;  %p964_p10 = scmp.lt.s32.totalorder %s962_s21, %s958_s8 }
 0x1c9   : > { %p960_p6 = pnand %p959_p5, %p1128_p3  ;;  %p965_p11 = por %p964_p10, %p963_p9 }
 0x1cb   : > { %p961_p7 = pneg %p960_p6 }
 0x1cd   : > { %p966_p12 = pnand %p965_p11, %p961_p7 }
 0x1cf   : > { %969 = shalt.err (!%p966_p12)
}
 0x1d0   : > { %821 = dma.vmem_to_hbm [thread:$0]  (%p1128_p3), %s652_s17, 128, %s654_s23, %s633_s24  }
 0x1d1 PF: > { %p827_p13 = scmp.ge.s32.totalorder %s1036_s25, 2  ;;  %s668_s10 = sand.u32 1, %s1008_s18  }
 0x1d2   : > { %s669_s14 = scalar_lea.sflag [#allocation4], %s668_s10 }
 0x1d3   : > { %p824_p0 = pnand %p827_p13, %p1137_p8 }
 0x1d5   : > { %p825_p1 = pneg %p824_p0 }
 0x1d7   : > { %1003 = dma.done.wait (%p825_p1), %s669_s14, 128  }
 0x1d8   : > { %1005 = vsyncadd (%p825_p1), %s669_s14, 4294967168  ;;  %s19_s25 = sadd.s32 1, %s1036_s25   ;;  %s1276_s13 = sld [smem:[#allocation10_spill]] }
 0x1d9   : > { %p16_p2 = scmp.ge.s32.totalorder %s19_s25, 8   ;;  %s1277_s21 = sld [smem:[#allocation6_spill]] }
 0x1da   : > { %s1278_s22 = sld [smem:[#allocation7_spill]]  ;;  %s1281_s18 = smov %s1012_s19 }
 0x1db   : > { %s1279_s23 = sld [smem:[#allocation8_spill]]  ;;  %s1282_s19 = smov %s1016_s20 }
 0x1dc   : > { %s1280_s24 = sld [smem:[#allocation9_spill]]  ;;  %18 = sbr.rel (!%p16_p2) target bundleno = 5 (0x5), region = 105 }
 0x1de   : > { %s1283_s20 = smov %s1276_s13 }
 0x1e1   :  { %682 = vsyncpa [#allocation4], 1 }
 0x1e2   :  { %684 = vsyncpa [#allocation4 + $0x1], 1 }

</bundles_post_ra>
